<compile_context>
chip_gen: v7x
topology: tpu7x:2x2x1
jax: 0.10.0
libtpu: 0.0.40
codegen_flags: <defaults>
</compile_context>

<pallas_src>
import math

import jax
import jax.numpy as jnp
from jax.experimental import pallas as pl
from jax.experimental.pallas import tpu as pltpu

# ---- config (small, consistent with the GPT Block module) ----
B = 2          # batch
T = 8          # sequence length (== block_size), power of two
C = 32         # n_embd
H = 4          # n_head
HD = C // H    # head dim
EPS = 1e-5     # nn.LayerNorm default eps


def _gelu_tanh(x):
    c = math.sqrt(2.0 / math.pi)
    return 0.5 * x * (1.0 + jnp.tanh(c * (x + 0.044715 * x * x * x)))


def _layernorm(x, g, b):
    # two-pass (centered) variance: no E[x^2]-E[x]^2 cancellation
    mu = jnp.mean(x, axis=-1, keepdims=True)
    xc = x - mu
    var = jnp.mean(xc * xc, axis=-1, keepdims=True)
    return xc * jax.lax.rsqrt(var + EPS) * g + b


def block_kernel(x_ref, wqkv_ref, wo_ref, wfc_ref, wpr_ref, vec_ref,
                 o_ref, attn_sc):
    R = x_ref.shape[0]                      # rows this grid step (T or B*T)
    nb = R // T                             # batch elements this step

    x = x_ref[...]                          # (R, C) f32

    # ---- packed 1-D params (single DMA): static lane slices, done once ----
    vec = vec_ref[...]                      # (8, 128) f32
    ln1_g = vec[0:1, 0:C]
    ln1_b = vec[0:1, C:2 * C]
    ln2_g = vec[0:1, 2 * C:3 * C]
    ln2_b = vec[0:1, 3 * C:4 * C]
    bqkv = vec[1:2, 0:3 * C]
    bo = vec[1:2, 3 * C:4 * C]
    bfc = vec[2:3, 0:4 * C]
    bpr = vec[3:4, 0:C]

    # ---- ln_1 ----
    h1 = _layernorm(x, ln1_g, ln1_b)

    # ---- fused QKV projection: one (R,C)x(C,3C) bf16 MXU matmul, f32 acc ----
    qkv = jnp.dot(h1.astype(jnp.bfloat16), wqkv_ref[...],
                  preferred_element_type=jnp.float32) + bqkv        # (R,3C) f32

    # ---- scores for every (batch, head), then ONE batched softmax ----
    score_list = []
    for b in range(nb):
        r0 = b * T
        for h in range(H):
            c0 = h * HD
            q = qkv[r0:r0 + T, c0:c0 + HD]                    # (T, HD) f32
            k = qkv[r0:r0 + T, C + c0:C + c0 + HD]
            score_list.append(jnp.dot(q, k.T,
                                      preferred_element_type=jnp.float32))
    s = jnp.concatenate(score_list, axis=0)                   # (nb*H*T, T) f32

    # additive causal mask built once for the whole stacked-score tile
    ri = jax.lax.broadcasted_iota(jnp.int32, (nb * H * T, T), 0)
    ci = jax.lax.broadcasted_iota(jnp.int32, (nb * H * T, T), 1)
    ti = jnp.bitwise_and(ri, T - 1)                           # T is a power of 2
    neg_mask = jnp.where(ci <= ti, 0.0, -1e30).astype(jnp.float32)

    s = s * (1.0 / math.sqrt(HD)) + neg_mask
    m = jnp.max(s, axis=-1, keepdims=True)
    p = jnp.exp(s - m)
    l = jnp.sum(p, axis=-1, keepdims=True)
    p = p * pl.reciprocal(l, approx=True)                     # EUP, ~1e-3 rel err

    # ---- p @ v per head, written straight into the VMEM attention slab ----
    for b in range(nb):
        r0 = b * T
        for h in range(H):
            c0 = h * HD
            idx = b * H + h
            v = qkv[r0:r0 + T, 2 * C + c0:2 * C + c0 + HD]
            p_h = p[idx * T:(idx + 1) * T, :]
            attn_sc[r0:r0 + T, c0:c0 + HD] = jnp.dot(
                p_h, v, preferred_element_type=jnp.float32)

    # ---- single output projection: (R,C)x(C,C), bf16 operands ----
    attn = jnp.dot(attn_sc[...].astype(jnp.bfloat16), wo_ref[...],
                   preferred_element_type=jnp.float32) + bo

    x2 = x + attn                                             # residual 1

    # ---- ln_2 + MLP ----
    h2 = _layernorm(x2, ln2_g, ln2_b)
    fc = jnp.dot(h2.astype(jnp.bfloat16), wfc_ref[...],
                 preferred_element_type=jnp.float32) + bfc
    g = _gelu_tanh(fc)
    mlp = jnp.dot(g.astype(jnp.bfloat16), wpr_ref[...],
                  preferred_element_type=jnp.float32) + bpr

    o_ref[...] = x2 + mlp                                     # residual 2


def _tc_per_chip():
    """Best-effort TensorCore-per-chip count (2 on v7x, 1 on v5e/v6e)."""
    try:
        kind = jax.devices()[0].device_kind.lower()
    except Exception:
        return 1
    return 2 if ("v7" in kind or "7x" in kind) else 1


def prepare_block_params(params):
    """One-time packing (outside the hot path): bf16 weights + one bias slab."""
    (ln1_g, ln1_b, wqkv, bqkv, wo, bo, ln2_g, ln2_b,
     wfc, bfc, wpr, bpr) = params
    vec = jnp.zeros((8, 128), jnp.float32)
    vec = vec.at[0, 0:C].set(ln1_g[0])
    vec = vec.at[0, C:2 * C].set(ln1_b[0])
    vec = vec.at[0, 2 * C:3 * C].set(ln2_g[0])
    vec = vec.at[0, 3 * C:4 * C].set(ln2_b[0])
    vec = vec.at[1, 0:3 * C].set(bqkv[0])
    vec = vec.at[1, 3 * C:4 * C].set(bo[0])
    vec = vec.at[2, 0:4 * C].set(bfc[0])
    vec = vec.at[3, 0:C].set(bpr[0])
    return (wqkv.astype(jnp.bfloat16), wo.astype(jnp.bfloat16),
            wfc.astype(jnp.bfloat16), wpr.astype(jnp.bfloat16), vec)


def gpt_block(x, kparams, *, split_batch=None):
    wqkv, wo, wfc, wpr, vec = kparams
    if split_batch is None:
        split_batch = _tc_per_chip() >= 2 and B >= 2

    if split_batch:
        # v7x: one batch element per grid step, sharded across the 2 TCs.
        grid = (B,)
        rows = T
        xo_spec = pl.BlockSpec((T, C), lambda i: (i, 0))
        sem = ("parallel",)
    else:
        # single-TC v5e/v6e: whole batch in one step (no per-batch grid cost).
        grid = (1,)
        rows = B * T
        xo_spec = pl.BlockSpec((B * T, C), lambda i: (0, 0))
        sem = ("arbitrary",)

    w_spec = lambda shape: pl.BlockSpec(shape, lambda i: (0, 0))
    x2d = x.reshape(B * T, C)

    out2d = pl.pallas_call(
        block_kernel,
        out_shape=jax.ShapeDtypeStruct((B * T, C), jnp.float32),
        grid_spec=pltpu.PrefetchScalarGridSpec(
            num_scalar_prefetch=0,
            grid=grid,
            in_specs=[
                xo_spec,                 # x
                w_spec((C, 3 * C)),      # Wqkv (bf16)
                w_spec((C, C)),          # Wo   (bf16)
                w_spec((C, 4 * C)),      # Wfc  (bf16)
                w_spec((4 * C, C)),      # Wproj(bf16)
                w_spec((8, 128)),        # packed LN params + biases (f32)
            ],
            out_specs=xo_spec,
            scratch_shapes=[pltpu.VMEM((rows, C), jnp.float32)],  # attn slab
        ),
        compiler_params=pltpu.CompilerParams(dimension_semantics=sem),
    )(x2d, wqkv, wo, wfc, wpr, vec)

    return out2d.reshape(B, T, C)


def reference_block(x, params):
    """Pure-JAX f32 reference of the PyTorch Block forward."""
    (ln1_g, ln1_b, wqkv, bqkv, wo, bo, ln2_g, ln2_b,
     wfc, bfc, wpr, bpr) = params
    h1 = _layernorm(x, ln1_g[0], ln1_b[0])                     # (B,T,C)
    qkv = h1 @ wqkv + bqkv[0]                                  # (B,T,3C)
    q, k, v = jnp.split(qkv, 3, axis=-1)
    q = q.reshape(B, T, H, HD).transpose(0, 2, 1, 3)
    k = k.reshape(B, T, H, HD).transpose(0, 2, 1, 3)
    v = v.reshape(B, T, H, HD).transpose(0, 2, 1, 3)
    s = jnp.einsum('bhtd,bhsd->bhts', q, k) / math.sqrt(HD)
    mask = jnp.tril(jnp.ones((T, T), bool))
    s = jnp.where(mask, s, -jnp.inf)
    p = jax.nn.softmax(s, axis=-1)
    oh = jnp.einsum('bhts,bhsd->bhtd', p, v)
    attn = oh.transpose(0, 2, 1, 3).reshape(B, T, C) @ wo + bo[0]
    x2 = x + attn
    h2 = _layernorm(x2, ln2_g[0], ln2_b[0])
    fc = _gelu_tanh(h2 @ wfc + bfc[0])
    return x2 + fc @ wpr + bpr[0]


def make_params(key):
    ks = jax.random.split(key, 6)
    std = 0.02
    ln1_g = jnp.ones((1, C), jnp.float32)
    ln1_b = jnp.zeros((1, C), jnp.float32)
    ln2_g = jnp.ones((1, C), jnp.float32)
    ln2_b = jnp.zeros((1, C), jnp.float32)
    # fused c_attn: (C, 3C) weight (x @ W layout), (1, 3C) bias
    wqkv = jax.random.normal(ks[0], (C, 3 * C), jnp.float32) * std
    bqkv = jax.random.normal(ks[1], (1, 3 * C), jnp.float32) * std
    # attention output projection c_proj: (C, C)
    wo = jax.random.normal(ks[2], (C, C), jnp.float32) * std
    bo = jnp.zeros((1, C), jnp.float32)
    # MLP
    wfc = jax.random.normal(ks[3], (C, 4 * C), jnp.float32) * std
    bfc = jnp.zeros((1, 4 * C), jnp.float32)
    wpr = jax.random.normal(ks[4], (4 * C, C), jnp.float32) * std
    bpr = jnp.zeros((1, C), jnp.float32)
    return (ln1_g, ln1_b, wqkv, bqkv, wo, bo,
            ln2_g, ln2_b, wfc, bfc, wpr, bpr)


if __name__ == "__main__":
    key = jax.random.PRNGKey(0)
    kx, kp = jax.random.split(key)
    x = jax.random.normal(kx, (B, T, C), jnp.float32)
    params = make_params(kp)

    kparams = prepare_block_params(params)        # one-time pack / bf16 cast

    out = gpt_block(x, kparams)
    out = jax.block_until_ready(out)

    ref = reference_block(x, params)
    assert out.shape == (B, T, C)
    # tolerance covers bf16 projection matmuls + approx-EUP softmax reciprocal
    assert jnp.allclose(out, ref, rtol=1e-2, atol=2e-3), (
        float(jnp.max(jnp.abs(out - ref))))

    print("KERNEL_OK")
</pallas_src>

<mosaic_0001>
module attributes {stable_mosaic.version = 11 : i64} {
  func.func @block_kernel(%arg0: i32, %arg1: memref<16x32xf32, #tpu.memory_space<vmem>>, %arg2: memref<32x96xbf16, #tpu.memory_space<vmem>>, %arg3: memref<32x32xbf16, #tpu.memory_space<vmem>>, %arg4: memref<32x128xbf16, #tpu.memory_space<vmem>>, %arg5: memref<128x32xbf16, #tpu.memory_space<vmem>>, %arg6: memref<8x128xf32, #tpu.memory_space<vmem>>, %arg7: memref<16x32xf32, #tpu.memory_space<vmem>>, %arg8: memref<16x32xf32, #tpu.memory_space<vmem>>) attributes {dimension_semantics = [#tpu.dimension_semantics<arbitrary>], iteration_bounds = array<i64: 1>, scalar_prefetch = 0 : i64, scratch_operands = 1 : i64, tpu.core_type = #tpu.core_type<tc>, window_params = [{pipeline_mode = #tpu.pipeline_mode<synchronous>, transform_indices = @transform_0, window_bounds = array<i64: 16, 32>}, {pipeline_mode = #tpu.pipeline_mode<synchronous>, transform_indices = @transform_1, window_bounds = array<i64: 32, 96>}, {pipeline_mode = #tpu.pipeline_mode<synchronous>, transform_indices = @transform_2, window_bounds = array<i64: 32, 32>}, {pipeline_mode = #tpu.pipeline_mode<synchronous>, transform_indices = @transform_3, window_bounds = array<i64: 32, 128>}, {pipeline_mode = #tpu.pipeline_mode<synchronous>, transform_indices = @transform_4, window_bounds = array<i64: 128, 32>}, {pipeline_mode = #tpu.pipeline_mode<synchronous>, transform_indices = @transform_5, window_bounds = array<i64: 8, 128>}, {pipeline_mode = #tpu.pipeline_mode<synchronous>, transform_indices = @transform_6, window_bounds = array<i64: 16, 32>}]} {
    %c0 = arith.constant 0 : index
    %c0_0 = arith.constant 0 : index
    %0 = vector.load %arg1[%c0, %c0_0] : memref<16x32xf32, #tpu.memory_space<vmem>>, vector<16x32xf32>
    %c0_1 = arith.constant 0 : index
    %c0_2 = arith.constant 0 : index
    %1 = vector.load %arg6[%c0_1, %c0_2] : memref<8x128xf32, #tpu.memory_space<vmem>>, vector<8x128xf32>
    %2 = vector.extract_strided_slice %1 {offsets = [0, 0], sizes = [1, 32], strides = [1, 1]} : vector<8x128xf32> to vector<1x32xf32>
    %3 = vector.extract_strided_slice %1 {offsets = [0, 32], sizes = [1, 32], strides = [1, 1]} : vector<8x128xf32> to vector<1x32xf32>
    %4 = vector.extract_strided_slice %1 {offsets = [0, 64], sizes = [1, 32], strides = [1, 1]} : vector<8x128xf32> to vector<1x32xf32>
    %5 = vector.extract_strided_slice %1 {offsets = [0, 96], sizes = [1, 32], strides = [1, 1]} : vector<8x128xf32> to vector<1x32xf32>
    %6 = vector.extract_strided_slice %1 {offsets = [1, 0], sizes = [1, 96], strides = [1, 1]} : vector<8x128xf32> to vector<1x96xf32>
    %7 = vector.extract_strided_slice %1 {offsets = [1, 96], sizes = [1, 32], strides = [1, 1]} : vector<8x128xf32> to vector<1x32xf32>
    %8 = vector.extract_strided_slice %1 {offsets = [2, 0], sizes = [1, 128], strides = [1, 1]} : vector<8x128xf32> to vector<1x128xf32>
    %9 = vector.extract_strided_slice %1 {offsets = [3, 0], sizes = [1, 32], strides = [1, 1]} : vector<8x128xf32> to vector<1x32xf32>
    %cst = arith.constant dense<0.000000e+00> : vector<16xf32>
    %10 = vector.multi_reduction <add>, %0, %cst [1] : vector<16x32xf32> to vector<16xf32>
    %11 = vector.shape_cast %10 : vector<16xf32> to vector<16x1xf32>
    %cst_3 = arith.constant 3.200000e+01 : f32
    %12 = vector.broadcast %cst_3 : f32 to vector<16x1xf32>
    %13 = arith.divf %11, %12 : vector<16x1xf32>
    %14 = vector.broadcast %13 : vector<16x1xf32> to vector<16x32xf32>
    %15 = arith.subf %0, %14 : vector<16x32xf32>
    %16 = arith.mulf %15, %15 : vector<16x32xf32>
    %cst_4 = arith.constant dense<0.000000e+00> : vector<16xf32>
    %17 = vector.multi_reduction <add>, %16, %cst_4 [1] : vector<16x32xf32> to vector<16xf32>
    %18 = vector.shape_cast %17 : vector<16xf32> to vector<16x1xf32>
    %cst_5 = arith.constant 3.200000e+01 : f32
    %19 = vector.broadcast %cst_5 : f32 to vector<16x1xf32>
    %20 = arith.divf %18, %19 : vector<16x1xf32>
    %cst_6 = arith.constant 9.99999974E-6 : f32
    %21 = vector.broadcast %cst_6 : f32 to vector<16x1xf32>
    %22 = arith.addf %20, %21 : vector<16x1xf32>
    %23 = math.rsqrt %22 : vector<16x1xf32>
    %24 = vector.broadcast %23 : vector<16x1xf32> to vector<16x32xf32>
    %25 = arith.mulf %15, %24 : vector<16x32xf32>
    %26 = vector.broadcast %2 : vector<1x32xf32> to vector<16x32xf32>
    %27 = arith.mulf %25, %26 : vector<16x32xf32>
    %28 = vector.broadcast %3 : vector<1x32xf32> to vector<16x32xf32>
    %29 = arith.addf %27, %28 : vector<16x32xf32>
    %30 = arith.truncf %29 : vector<16x32xf32> to vector<16x32xbf16>
    %c0_7 = arith.constant 0 : index
    %c0_8 = arith.constant 0 : index
    %31 = vector.load %arg2[%c0_7, %c0_8] : memref<32x96xbf16, #tpu.memory_space<vmem>>, vector<32x96xbf16>
    %cst_9 = arith.constant dense<0.000000e+00> : vector<16x96xf32>
    %32 = tpu.matmul %30, %31, %cst_9 {dimension_numbers = #tpu.dot_dimension_numbers<[1], [0], [0], [1], [0, 0, 1, 1], [], []>} : vector<16x32xbf16>, vector<32x96xbf16>, vector<16x96xf32> -> vector<16x96xf32>
    %33 = vector.broadcast %6 : vector<1x96xf32> to vector<16x96xf32>
    %34 = arith.addf %32, %33 : vector<16x96xf32>
    %35 = vector.extract_strided_slice %34 {offsets = [0, 0], sizes = [8, 8], strides = [1, 1]} : vector<16x96xf32> to vector<8x8xf32>
    %36 = vector.extract_strided_slice %34 {offsets = [0, 32], sizes = [8, 8], strides = [1, 1]} : vector<16x96xf32> to vector<8x8xf32>
    %37 = tpu.transpose %36, [1, 0] : vector<8x8xf32> -> vector<8x8xf32>
    %cst_10 = arith.constant dense<0.000000e+00> : vector<8x8xf32>
    %38 = tpu.matmul %35, %37, %cst_10 {dimension_numbers = #tpu.dot_dimension_numbers<[1], [0], [0], [1], [0, 0, 1, 1], [], []>} : vector<8x8xf32>, vector<8x8xf32>, vector<8x8xf32> -> vector<8x8xf32>
    %39 = vector.extract_strided_slice %34 {offsets = [0, 8], sizes = [8, 8], strides = [1, 1]} : vector<16x96xf32> to vector<8x8xf32>
    %40 = vector.extract_strided_slice %34 {offsets = [0, 40], sizes = [8, 8], strides = [1, 1]} : vector<16x96xf32> to vector<8x8xf32>
    %41 = tpu.transpose %40, [1, 0] : vector<8x8xf32> -> vector<8x8xf32>
    %cst_11 = arith.constant dense<0.000000e+00> : vector<8x8xf32>
    %42 = tpu.matmul %39, %41, %cst_11 {dimension_numbers = #tpu.dot_dimension_numbers<[1], [0], [0], [1], [0, 0, 1, 1], [], []>} : vector<8x8xf32>, vector<8x8xf32>, vector<8x8xf32> -> vector<8x8xf32>
    %43 = vector.extract_strided_slice %34 {offsets = [0, 16], sizes = [8, 8], strides = [1, 1]} : vector<16x96xf32> to vector<8x8xf32>
    %44 = vector.extract_strided_slice %34 {offsets = [0, 48], sizes = [8, 8], strides = [1, 1]} : vector<16x96xf32> to vector<8x8xf32>
    %45 = tpu.transpose %44, [1, 0] : vector<8x8xf32> -> vector<8x8xf32>
    %cst_12 = arith.constant dense<0.000000e+00> : vector<8x8xf32>
    %46 = tpu.matmul %43, %45, %cst_12 {dimension_numbers = #tpu.dot_dimension_numbers<[1], [0], [0], [1], [0, 0, 1, 1], [], []>} : vector<8x8xf32>, vector<8x8xf32>, vector<8x8xf32> -> vector<8x8xf32>
    %47 = vector.extract_strided_slice %34 {offsets = [0, 24], sizes = [8, 8], strides = [1, 1]} : vector<16x96xf32> to vector<8x8xf32>
    %48 = vector.extract_strided_slice %34 {offsets = [0, 56], sizes = [8, 8], strides = [1, 1]} : vector<16x96xf32> to vector<8x8xf32>
    %49 = tpu.transpose %48, [1, 0] : vector<8x8xf32> -> vector<8x8xf32>
    %cst_13 = arith.constant dense<0.000000e+00> : vector<8x8xf32>
    %50 = tpu.matmul %47, %49, %cst_13 {dimension_numbers = #tpu.dot_dimension_numbers<[1], [0], [0], [1], [0, 0, 1, 1], [], []>} : vector<8x8xf32>, vector<8x8xf32>, vector<8x8xf32> -> vector<8x8xf32>
    %51 = vector.extract_strided_slice %34 {offsets = [8, 0], sizes = [8, 8], strides = [1, 1]} : vector<16x96xf32> to vector<8x8xf32>
    %52 = vector.extract_strided_slice %34 {offsets = [8, 32], sizes = [8, 8], strides = [1, 1]} : vector<16x96xf32> to vector<8x8xf32>
    %53 = tpu.transpose %52, [1, 0] : vector<8x8xf32> -> vector<8x8xf32>
    %cst_14 = arith.constant dense<0.000000e+00> : vector<8x8xf32>
    %54 = tpu.matmul %51, %53, %cst_14 {dimension_numbers = #tpu.dot_dimension_numbers<[1], [0], [0], [1], [0, 0, 1, 1], [], []>} : vector<8x8xf32>, vector<8x8xf32>, vector<8x8xf32> -> vector<8x8xf32>
    %55 = vector.extract_strided_slice %34 {offsets = [8, 8], sizes = [8, 8], strides = [1, 1]} : vector<16x96xf32> to vector<8x8xf32>
    %56 = vector.extract_strided_slice %34 {offsets = [8, 40], sizes = [8, 8], strides = [1, 1]} : vector<16x96xf32> to vector<8x8xf32>
    %57 = tpu.transpose %56, [1, 0] : vector<8x8xf32> -> vector<8x8xf32>
    %cst_15 = arith.constant dense<0.000000e+00> : vector<8x8xf32>
    %58 = tpu.matmul %55, %57, %cst_15 {dimension_numbers = #tpu.dot_dimension_numbers<[1], [0], [0], [1], [0, 0, 1, 1], [], []>} : vector<8x8xf32>, vector<8x8xf32>, vector<8x8xf32> -> vector<8x8xf32>
    %59 = vector.extract_strided_slice %34 {offsets = [8, 16], sizes = [8, 8], strides = [1, 1]} : vector<16x96xf32> to vector<8x8xf32>
    %60 = vector.extract_strided_slice %34 {offsets = [8, 48], sizes = [8, 8], strides = [1, 1]} : vector<16x96xf32> to vector<8x8xf32>
    %61 = tpu.transpose %60, [1, 0] : vector<8x8xf32> -> vector<8x8xf32>
    %cst_16 = arith.constant dense<0.000000e+00> : vector<8x8xf32>
    %62 = tpu.matmul %59, %61, %cst_16 {dimension_numbers = #tpu.dot_dimension_numbers<[1], [0], [0], [1], [0, 0, 1, 1], [], []>} : vector<8x8xf32>, vector<8x8xf32>, vector<8x8xf32> -> vector<8x8xf32>
    %63 = vector.extract_strided_slice %34 {offsets = [8, 24], sizes = [8, 8], strides = [1, 1]} : vector<16x96xf32> to vector<8x8xf32>
    %64 = vector.extract_strided_slice %34 {offsets = [8, 56], sizes = [8, 8], strides = [1, 1]} : vector<16x96xf32> to vector<8x8xf32>
    %65 = tpu.transpose %64, [1, 0] : vector<8x8xf32> -> vector<8x8xf32>
    %cst_17 = arith.constant dense<0.000000e+00> : vector<8x8xf32>
    %66 = tpu.matmul %63, %65, %cst_17 {dimension_numbers = #tpu.dot_dimension_numbers<[1], [0], [0], [1], [0, 0, 1, 1], [], []>} : vector<8x8xf32>, vector<8x8xf32>, vector<8x8xf32> -> vector<8x8xf32>
    %67 = tpu.concatenate %38, %42, %46, %50, %54, %58, %62, %66 in 0 : vector<8x8xf32>, vector<8x8xf32>, vector<8x8xf32>, vector<8x8xf32>, vector<8x8xf32>, vector<8x8xf32>, vector<8x8xf32>, vector<8x8xf32> -> vector<64x8xf32>
    %68 = tpu.iota {dimensions = array<i32: 0>} : vector<64x8xi32>
    %69 = tpu.iota {dimensions = array<i32: 1>} : vector<64x8xi32>
    %c7_i32 = arith.constant 7 : i32
    %70 = vector.broadcast %c7_i32 : i32 to vector<64x8xi32>
    %71 = arith.andi %68, %70 : vector<64x8xi32>
    %72 = arith.cmpi sle, %69, %71 : vector<64x8xi32>
    %cst_18 = arith.constant 0.000000e+00 : f32
    %cst_19 = arith.constant -1.000000e+30 : f32
    %73 = vector.broadcast %cst_18 : f32 to vector<64x8xf32>
    %74 = vector.broadcast %cst_19 : f32 to vector<64x8xf32>
    %75 = arith.select %72, %73, %74 : vector<64x8xi1>, vector<64x8xf32>
    %cst_20 = arith.constant 0.353553385 : f32
    %76 = vector.broadcast %cst_20 : f32 to vector<64x8xf32>
    %77 = arith.mulf %67, %76 : vector<64x8xf32>
    %78 = arith.addf %77, %75 : vector<64x8xf32>
    %cst_21 = arith.constant dense<0xFF800000> : vector<64xf32>
    %79 = vector.multi_reduction <maximumf>, %78, %cst_21 [1] : vector<64x8xf32> to vector<64xf32>
    %80 = vector.shape_cast %79 : vector<64xf32> to vector<64x1xf32>
    %81 = vector.broadcast %80 : vector<64x1xf32> to vector<64x8xf32>
    %82 = arith.subf %78, %81 : vector<64x8xf32>
    %83 = math.exp %82 : vector<64x8xf32>
    %cst_22 = arith.constant dense<0.000000e+00> : vector<64xf32>
    %84 = vector.multi_reduction <add>, %83, %cst_22 [1] : vector<64x8xf32> to vector<64xf32>
    %85 = vector.shape_cast %84 : vector<64xf32> to vector<64x1xf32>
    %86 = tpu.reciprocal %85 {approx = true} : vector<64x1xf32> -> vector<64x1xf32>
    %87 = vector.broadcast %86 : vector<64x1xf32> to vector<64x8xf32>
    %88 = arith.mulf %83, %87 : vector<64x8xf32>
    %89 = vector.extract_strided_slice %34 {offsets = [0, 64], sizes = [8, 8], strides = [1, 1]} : vector<16x96xf32> to vector<8x8xf32>
    %90 = vector.extract_strided_slice %88 {offsets = [0, 0], sizes = [8, 8], strides = [1, 1]} : vector<64x8xf32> to vector<8x8xf32>
    %cst_23 = arith.constant dense<0.000000e+00> : vector<8x8xf32>
    %91 = tpu.matmul %90, %89, %cst_23 {dimension_numbers = #tpu.dot_dimension_numbers<[1], [0], [0], [1], [0, 0, 1, 1], [], []>} : vector<8x8xf32>, vector<8x8xf32>, vector<8x8xf32> -> vector<8x8xf32>
    %c0_24 = arith.constant 0 : index
    %c0_25 = arith.constant 0 : index
    %92 = vector.load %arg8[%c0_24, %c0_25] : memref<16x32xf32, #tpu.memory_space<vmem>>, vector<8x8xf32>
    tpu.vector_store %arg8[%c0_24, %c0_25], %91 {strides = array<i32>} : memref<16x32xf32, #tpu.memory_space<vmem>>, vector<8x8xf32>,
    %93 = vector.extract_strided_slice %34 {offsets = [0, 72], sizes = [8, 8], strides = [1, 1]} : vector<16x96xf32> to vector<8x8xf32>
    %94 = vector.extract_strided_slice %88 {offsets = [8, 0], sizes = [8, 8], strides = [1, 1]} : vector<64x8xf32> to vector<8x8xf32>
    %cst_26 = arith.constant dense<0.000000e+00> : vector<8x8xf32>
    %95 = tpu.matmul %94, %93, %cst_26 {dimension_numbers = #tpu.dot_dimension_numbers<[1], [0], [0], [1], [0, 0, 1, 1], [], []>} : vector<8x8xf32>, vector<8x8xf32>, vector<8x8xf32> -> vector<8x8xf32>
    %c0_27 = arith.constant 0 : index
    %c8 = arith.constant 8 : index
    %96 = vector.load %arg8[%c0_27, %c8] : memref<16x32xf32, #tpu.memory_space<vmem>>, vector<8x8xf32>
    tpu.vector_store %arg8[%c0_27, %c8], %95 {strides = array<i32>} : memref<16x32xf32, #tpu.memory_space<vmem>>, vector<8x8xf32>,
    %97 = vector.extract_strided_slice %34 {offsets = [0, 80], sizes = [8, 8], strides = [1, 1]} : vector<16x96xf32> to vector<8x8xf32>
    %98 = vector.extract_strided_slice %88 {offsets = [16, 0], sizes = [8, 8], strides = [1, 1]} : vector<64x8xf32> to vector<8x8xf32>
    %cst_28 = arith.constant dense<0.000000e+00> : vector<8x8xf32>
    %99 = tpu.matmul %98, %97, %cst_28 {dimension_numbers = #tpu.dot_dimension_numbers<[1], [0], [0], [1], [0, 0, 1, 1], [], []>} : vector<8x8xf32>, vector<8x8xf32>, vector<8x8xf32> -> vector<8x8xf32>
    %c0_29 = arith.constant 0 : index
    %c16 = arith.constant 16 : index
    %100 = vector.load %arg8[%c0_29, %c16] : memref<16x32xf32, #tpu.memory_space<vmem>>, vector<8x8xf32>
    tpu.vector_store %arg8[%c0_29, %c16], %99 {strides = array<i32>} : memref<16x32xf32, #tpu.memory_space<vmem>>, vector<8x8xf32>,
    %101 = vector.extract_strided_slice %34 {offsets = [0, 88], sizes = [8, 8], strides = [1, 1]} : vector<16x96xf32> to vector<8x8xf32>
    %102 = vector.extract_strided_slice %88 {offsets = [24, 0], sizes = [8, 8], strides = [1, 1]} : vector<64x8xf32> to vector<8x8xf32>
    %cst_30 = arith.constant dense<0.000000e+00> : vector<8x8xf32>
    %103 = tpu.matmul %102, %101, %cst_30 {dimension_numbers = #tpu.dot_dimension_numbers<[1], [0], [0], [1], [0, 0, 1, 1], [], []>} : vector<8x8xf32>, vector<8x8xf32>, vector<8x8xf32> -> vector<8x8xf32>
    %c0_31 = arith.constant 0 : index
    %c24 = arith.constant 24 : index
    %104 = vector.load %arg8[%c0_31, %c24] : memref<16x32xf32, #tpu.memory_space<vmem>>, vector<8x8xf32>
    tpu.vector_store %arg8[%c0_31, %c24], %103 {strides = array<i32>} : memref<16x32xf32, #tpu.memory_space<vmem>>, vector<8x8xf32>,
    %105 = vector.extract_strided_slice %34 {offsets = [8, 64], sizes = [8, 8], strides = [1, 1]} : vector<16x96xf32> to vector<8x8xf32>
    %106 = vector.extract_strided_slice %88 {offsets = [32, 0], sizes = [8, 8], strides = [1, 1]} : vector<64x8xf32> to vector<8x8xf32>
    %cst_32 = arith.constant dense<0.000000e+00> : vector<8x8xf32>
    %107 = tpu.matmul %106, %105, %cst_32 {dimension_numbers = #tpu.dot_dimension_numbers<[1], [0], [0], [1], [0, 0, 1, 1], [], []>} : vector<8x8xf32>, vector<8x8xf32>, vector<8x8xf32> -> vector<8x8xf32>
    %c8_33 = arith.constant 8 : index
    %c0_34 = arith.constant 0 : index
    %108 = vector.load %arg8[%c8_33, %c0_34] : memref<16x32xf32, #tpu.memory_space<vmem>>, vector<8x8xf32>
    tpu.vector_store %arg8[%c8_33, %c0_34], %107 {strides = array<i32>} : memref<16x32xf32, #tpu.memory_space<vmem>>, vector<8x8xf32>,
    %109 = vector.extract_strided_slice %34 {offsets = [8, 72], sizes = [8, 8], strides = [1, 1]} : vector<16x96xf32> to vector<8x8xf32>
    %110 = vector.extract_strided_slice %88 {offsets = [40, 0], sizes = [8, 8], strides = [1, 1]} : vector<64x8xf32> to vector<8x8xf32>
    %cst_35 = arith.constant dense<0.000000e+00> : vector<8x8xf32>
    %111 = tpu.matmul %110, %109, %cst_35 {dimension_numbers = #tpu.dot_dimension_numbers<[1], [0], [0], [1], [0, 0, 1, 1], [], []>} : vector<8x8xf32>, vector<8x8xf32>, vector<8x8xf32> -> vector<8x8xf32>
    %c8_36 = arith.constant 8 : index
    %c8_37 = arith.constant 8 : index
    %112 = vector.load %arg8[%c8_36, %c8_37] : memref<16x32xf32, #tpu.memory_space<vmem>>, vector<8x8xf32>
    tpu.vector_store %arg8[%c8_36, %c8_37], %111 {strides = array<i32>} : memref<16x32xf32, #tpu.memory_space<vmem>>, vector<8x8xf32>,
    %113 = vector.extract_strided_slice %34 {offsets = [8, 80], sizes = [8, 8], strides = [1, 1]} : vector<16x96xf32> to vector<8x8xf32>
    %114 = vector.extract_strided_slice %88 {offsets = [48, 0], sizes = [8, 8], strides = [1, 1]} : vector<64x8xf32> to vector<8x8xf32>
    %cst_38 = arith.constant dense<0.000000e+00> : vector<8x8xf32>
    %115 = tpu.matmul %114, %113, %cst_38 {dimension_numbers = #tpu.dot_dimension_numbers<[1], [0], [0], [1], [0, 0, 1, 1], [], []>} : vector<8x8xf32>, vector<8x8xf32>, vector<8x8xf32> -> vector<8x8xf32>
    %c8_39 = arith.constant 8 : index
    %c16_40 = arith.constant 16 : index
    %116 = vector.load %arg8[%c8_39, %c16_40] : memref<16x32xf32, #tpu.memory_space<vmem>>, vector<8x8xf32>
    tpu.vector_store %arg8[%c8_39, %c16_40], %115 {strides = array<i32>} : memref<16x32xf32, #tpu.memory_space<vmem>>, vector<8x8xf32>,
    %117 = vector.extract_strided_slice %34 {offsets = [8, 88], sizes = [8, 8], strides = [1, 1]} : vector<16x96xf32> to vector<8x8xf32>
    %118 = vector.extract_strided_slice %88 {offsets = [56, 0], sizes = [8, 8], strides = [1, 1]} : vector<64x8xf32> to vector<8x8xf32>
    %cst_41 = arith.constant dense<0.000000e+00> : vector<8x8xf32>
    %119 = tpu.matmul %118, %117, %cst_41 {dimension_numbers = #tpu.dot_dimension_numbers<[1], [0], [0], [1], [0, 0, 1, 1], [], []>} : vector<8x8xf32>, vector<8x8xf32>, vector<8x8xf32> -> vector<8x8xf32>
    %c8_42 = arith.constant 8 : index
    %c24_43 = arith.constant 24 : index
    %120 = vector.load %arg8[%c8_42, %c24_43] : memref<16x32xf32, #tpu.memory_space<vmem>>, vector<8x8xf32>
    tpu.vector_store %arg8[%c8_42, %c24_43], %119 {strides = array<i32>} : memref<16x32xf32, #tpu.memory_space<vmem>>, vector<8x8xf32>,
    %c0_44 = arith.constant 0 : index
    %c0_45 = arith.constant 0 : index
    %121 = vector.load %arg8[%c0_44, %c0_45] : memref<16x32xf32, #tpu.memory_space<vmem>>, vector<16x32xf32>
    %122 = arith.truncf %121 : vector<16x32xf32> to vector<16x32xbf16>
    %c0_46 = arith.constant 0 : index
    %c0_47 = arith.constant 0 : index
    %123 = vector.load %arg3[%c0_46, %c0_47] : memref<32x32xbf16, #tpu.memory_space<vmem>>, vector<32x32xbf16>
    %cst_48 = arith.constant dense<0.000000e+00> : vector<16x32xf32>
    %124 = tpu.matmul %122, %123, %cst_48 {dimension_numbers = #tpu.dot_dimension_numbers<[1], [0], [0], [1], [0, 0, 1, 1], [], []>} : vector<16x32xbf16>, vector<32x32xbf16>, vector<16x32xf32> -> vector<16x32xf32>
    %125 = vector.broadcast %7 : vector<1x32xf32> to vector<16x32xf32>
    %126 = arith.addf %124, %125 : vector<16x32xf32>
    %127 = arith.addf %0, %126 : vector<16x32xf32>
    %cst_49 = arith.constant dense<0.000000e+00> : vector<16xf32>
    %128 = vector.multi_reduction <add>, %127, %cst_49 [1] : vector<16x32xf32> to vector<16xf32>
    %129 = vector.shape_cast %128 : vector<16xf32> to vector<16x1xf32>
    %cst_50 = arith.constant 3.200000e+01 : f32
    %130 = vector.broadcast %cst_50 : f32 to vector<16x1xf32>
    %131 = arith.divf %129, %130 : vector<16x1xf32>
    %132 = vector.broadcast %131 : vector<16x1xf32> to vector<16x32xf32>
    %133 = arith.subf %127, %132 : vector<16x32xf32>
    %134 = arith.mulf %133, %133 : vector<16x32xf32>
    %cst_51 = arith.constant dense<0.000000e+00> : vector<16xf32>
    %135 = vector.multi_reduction <add>, %134, %cst_51 [1] : vector<16x32xf32> to vector<16xf32>
    %136 = vector.shape_cast %135 : vector<16xf32> to vector<16x1xf32>
    %cst_52 = arith.constant 3.200000e+01 : f32
    %137 = vector.broadcast %cst_52 : f32 to vector<16x1xf32>
    %138 = arith.divf %136, %137 : vector<16x1xf32>
    %cst_53 = arith.constant 9.99999974E-6 : f32
    %139 = vector.broadcast %cst_53 : f32 to vector<16x1xf32>
    %140 = arith.addf %138, %139 : vector<16x1xf32>
    %141 = math.rsqrt %140 : vector<16x1xf32>
    %142 = vector.broadcast %141 : vector<16x1xf32> to vector<16x32xf32>
    %143 = arith.mulf %133, %142 : vector<16x32xf32>
    %144 = vector.broadcast %4 : vector<1x32xf32> to vector<16x32xf32>
    %145 = arith.mulf %143, %144 : vector<16x32xf32>
    %146 = vector.broadcast %5 : vector<1x32xf32> to vector<16x32xf32>
    %147 = arith.addf %145, %146 : vector<16x32xf32>
    %148 = arith.truncf %147 : vector<16x32xf32> to vector<16x32xbf16>
    %c0_54 = arith.constant 0 : index
    %c0_55 = arith.constant 0 : index
    %149 = vector.load %arg4[%c0_54, %c0_55] : memref<32x128xbf16, #tpu.memory_space<vmem>>, vector<32x128xbf16>
    %cst_56 = arith.constant dense<0.000000e+00> : vector<16x128xf32>
    %150 = tpu.matmul %148, %149, %cst_56 {dimension_numbers = #tpu.dot_dimension_numbers<[1], [0], [0], [1], [0, 0, 1, 1], [], []>} : vector<16x32xbf16>, vector<32x128xbf16>, vector<16x128xf32> -> vector<16x128xf32>
    %151 = vector.broadcast %8 : vector<1x128xf32> to vector<16x128xf32>
    %152 = arith.addf %150, %151 : vector<16x128xf32>
    %cst_57 = arith.constant 5.000000e-01 : f32
    %153 = vector.broadcast %cst_57 : f32 to vector<16x128xf32>
    %154 = arith.mulf %153, %152 : vector<16x128xf32>
    %cst_58 = arith.constant 4.471500e-02 : f32
    %155 = vector.broadcast %cst_58 : f32 to vector<16x128xf32>
    %156 = arith.mulf %155, %152 : vector<16x128xf32>
    %157 = arith.mulf %156, %152 : vector<16x128xf32>
    %158 = arith.mulf %157, %152 : vector<16x128xf32>
    %159 = arith.addf %152, %158 : vector<16x128xf32>
    %cst_59 = arith.constant 0.797884583 : f32
    %160 = vector.broadcast %cst_59 : f32 to vector<16x128xf32>
    %161 = arith.mulf %160, %159 : vector<16x128xf32>
    %162 = math.tanh %161 : vector<16x128xf32>
    %cst_60 = arith.constant 1.000000e+00 : f32
    %163 = vector.broadcast %cst_60 : f32 to vector<16x128xf32>
    %164 = arith.addf %163, %162 : vector<16x128xf32>
    %165 = arith.mulf %154, %164 : vector<16x128xf32>
    %166 = arith.truncf %165 : vector<16x128xf32> to vector<16x128xbf16>
    %c0_61 = arith.constant 0 : index
    %c0_62 = arith.constant 0 : index
    %167 = vector.load %arg5[%c0_61, %c0_62] : memref<128x32xbf16, #tpu.memory_space<vmem>>, vector<128x32xbf16>
    %cst_63 = arith.constant dense<0.000000e+00> : vector<16x32xf32>
    %168 = tpu.matmul %166, %167, %cst_63 {dimension_numbers = #tpu.dot_dimension_numbers<[1], [0], [0], [1], [0, 0, 1, 1], [], []>} : vector<16x128xbf16>, vector<128x32xbf16>, vector<16x32xf32> -> vector<16x32xf32>
    %169 = vector.broadcast %9 : vector<1x32xf32> to vector<16x32xf32>
    %170 = arith.addf %168, %169 : vector<16x32xf32>
    %171 = arith.addf %127, %170 : vector<16x32xf32>
    %c0_64 = arith.constant 0 : index
    %c0_65 = arith.constant 0 : index
    %172 = vector.load %arg7[%c0_64, %c0_65] : memref<16x32xf32, #tpu.memory_space<vmem>>, vector<16x32xf32>
    tpu.vector_store %arg7[%c0_64, %c0_65], %171 {strides = array<i32>} : memref<16x32xf32, #tpu.memory_space<vmem>>, vector<16x32xf32>,
    return
  }
  func.func @transform_0(%arg0: i32) -> (i32, i32) {
    %c0_i32 = arith.constant 0 : i32
    %c0_i32_0 = arith.constant 0 : i32
    %c0_i32_1 = arith.constant 0 : i32
    return %c0_i32, %c0_i32_0 : i32, i32
  }
  func.func @transform_1(%arg0: i32) -> (i32, i32) {
    %c0_i32 = arith.constant 0 : i32
    %c0_i32_0 = arith.constant 0 : i32
    %c0_i32_1 = arith.constant 0 : i32
    return %c0_i32, %c0_i32_0 : i32, i32
  }
  func.func @transform_2(%arg0: i32) -> (i32, i32) {
    %c0_i32 = arith.constant 0 : i32
    %c0_i32_0 = arith.constant 0 : i32
    %c0_i32_1 = arith.constant 0 : i32
    return %c0_i32, %c0_i32_0 : i32, i32
  }
  func.func @transform_3(%arg0: i32) -> (i32, i32) {
    %c0_i32 = arith.constant 0 : i32
    %c0_i32_0 = arith.constant 0 : i32
    %c0_i32_1 = arith.constant 0 : i32
    return %c0_i32, %c0_i32_0 : i32, i32
  }
  func.func @transform_4(%arg0: i32) -> (i32, i32) {
    %c0_i32 = arith.constant 0 : i32
    %c0_i32_0 = arith.constant 0 : i32
    %c0_i32_1 = arith.constant 0 : i32
    return %c0_i32, %c0_i32_0 : i32, i32
  }
  func.func @transform_5(%arg0: i32) -> (i32, i32) {
    %c0_i32 = arith.constant 0 : i32
    %c0_i32_0 = arith.constant 0 : i32
    %c0_i32_1 = arith.constant 0 : i32
    return %c0_i32, %c0_i32_0 : i32, i32
  }
  func.func @transform_6(%arg0: i32) -> (i32, i32) {
    %c0_i32 = arith.constant 0 : i32
    %c0_i32_0 = arith.constant 0 : i32
    %c0_i32_1 = arith.constant 0 : i32
    return %c0_i32, %c0_i32_0 : i32, i32
  }
}

</mosaic_0001>

<bundles_post_ra>
// kernel: tpu_custom_call.1
= control target key start
LH: loop header
LB: loop body
LE: loop exit
PB: predicated region body
PF: predicated region fallthrough
CT: control target
= control target key end

     0   :  { %vm28_vm0 = vcmask 261120   ;;  %s2563_s0 = inlined_call_operand.vmem [shape: f32[16,32], index: 0, kind: input, shape index: {}]   ;;  %s2564_s1 = inlined_call_operand.vmem [shape: bf16[32,96], index: 1, kind: input, shape index: {}]   ;;  %s2565_s2 = inlined_call_operand.vmem [shape: bf16[32,32], index: 2, kind: input, shape index: {}]   ;;  %s2566_s3 = inlined_call_operand.vmem [shape: bf16[32,128], index: 3, kind: input, shape index: {}]   ;;  %s2567_s4 = inlined_call_operand.vmem [shape: bf16[128,32], index: 4, kind: input, shape index: {}]   ;;  %s2568_s5 = inlined_call_operand.vmem [shape: f32[8,128], index: 5, kind: input, shape index: {}]   ;;  %s2569_s6 = inlined_call_operand.hbm [shape: f32[16,32], index: 6, kind: output, shape index: {}]  }
   0x1   :  { %v2231_v0 = vld [vmem:[%s2563_s0] sm:$0xff]  ;;  %v2236_v1 = vld [vmem:[%s2563_s0 + $0x8] sm:$0xff] }
   0x2   :  { %v29_v2 = vsel %vm28_vm0, %v2231_v0, 0.0  ;;  %v32_v3 = vsel %vm28_vm0, %v2236_v1, 0.0 }
   0x3   :  { %30 = vadd.xlane.f32.xlu0 %v29_v2 }
   0x7   :  { %33 = vadd.xlane.f32.xlu0 %v32_v3 }
   0x8   :  { %11 = vsyncpa [#allocation4], 0  ;;  %v56_v4 = vlaneseq  ;;  %v2248_v6 = vld [vmem:[%s2568_s5] sm:$0xff]  ;;  %s2173_s0 = smov 96   ;;  %v2174_v20 = vmov 0.0   ;;  %v2092_v21 = vld [vmem:[%s2564_s1 + $0x8] sm:$0xff]  }
   0x9   :  { %v2091_v19 = vld [vmem:[%s2564_s1] sm:$0xff]   ;;  %1947 = vmatprep.subr.bf16.mxu0 %v2174_v20  ;;  %1960 = vmatprep.subr.mxu1 %v2174_v20  ;;  %vm2175_vm1 = vmmov 0   ;;  %s2176_s1 = smov 80   ;;  %s2177_s30 = smov 112   ;;  %vm136_vm2 = vcmask 64512   ;;  %vm1052_vm11 = vcmask 130112  }
   0xa   :  { %v2243_v5 = vshrl.u32 %v56_v4, 7  ;;  %1948 = vmatpush3.bf16.msra.mxu0 %v2091_v19  ;;  %1951 = vmatprep.mubr.msk.bf16.mxu0 %vm2175_vm1, %v2174_v20  ;;  %s2178_s7 = smov 88   ;;  %s2179_s8 = smov 120   ;;  %v2348_v60 = vand.u32 127, %v56_v4  ;;  %vm1134_vm12 = vcmask 195712   ;;  %vm1216_vm13 = vcmask 261312  }
   0xb   :  { %1949 = vmatprep.subr.bf16.mxu0 %v2174_v20  ;;  %1962 = vmatprep.mubr.msk.f32.mxu1 %vm2175_vm1, %v2174_v20  ;;  %s2180_s9 = smov 72   ;;  %s2181_s10 = smov 104  }
   0xc   :  { %v58_v7 = vsub.s32 0, %v2243_v5  ;;  %v75_v38 = vsub.s32 1, %v2243_v5  ;;  %v767_v61 = vand.u32 7, %v2243_v5  ;;  %v758_v62 = vadd.s32 8, %v2243_v5  ;;  %s2183_s11 = smov 64   ;;  %s2184_s12 = smov 48  }
   0xd   :  { %v759_v2 = vadd.s32 16, %v2243_v5  ;;  %s2185_s13 = smov 56   ;;  %s2186_s14 = smov 40  }
   0xe   :  { %v2252_v8 = vrot.slane %v2248_v6, %v58_v7  ;;  %1950 = vmatpush3.bf16.msra.mxu0 %v2092_v21  ;;  %v2281_v39 = vrot.slane %v2248_v6, %v75_v38  ;;  %vm775_vm3 = vcmp.le.s32.totalorder %v2348_v60, %v767_v61  ;;  %v768_v63 = vand.u32 7, %v758_v62  ;;  %s2187_s15 = smov 8   ;;  %s2188_s16 = smov 16  }
   0xf   :  { %1955 = vmatprep.subr.mxu0 %v2174_v20  ;;  %v2182_v7 = vmov -1e+30   ;;  %v769_v4 = vand.u32 7, %v759_v2  ;;  %s2189_s17 = smov 24   ;;  %s2190_s22 = smov 32  }
  0x10   :  { %vm776_vm4 = vcmp.le.s32.totalorder %v2348_v60, %v768_v63 }
  0x11   :  { %vm777_vm5 = vcmp.le.s32.totalorder %v2348_v60, %v769_v4 }
  0x1d   :  { %63 = vrot.lane.b32.xlu0 %v2252_v8, %s2173_s0 }
  0x90   :  { %v31_v9 = vpop.xlane.xlu0 %30 }
  0x91   :  { %v36_v10 = vmul.f32 0.03125, %v31_v9  ;;  %v783_v9 = vsel %vm775_vm3, 0.0, %v2182_v7 }
  0x93   :  { %v38_v11 = vsub.f32 %v2231_v0, %v36_v10 }
  0x94   :  { %v34_v12 = vpop.xlane.xlu0 %33 }
  0x95   :  { %v37_v13 = vmul.f32 0.03125, %v34_v12  ;;  %v40_v14 = vmul.f32 %v38_v11, %v38_v11  ;;  %v761_v12 = vadd.s32 32, %v2243_v5 }
  0x97   :  { %v39_v15 = vsub.f32 %v2236_v1, %v37_v13  ;;  %v42_v16 = vsel %vm28_vm0, %v40_v14, 0.0  ;;  %v760_v13 = vadd.s32 24, %v2243_v5 }
  0x98   :  { %43 = vadd.xlane.f32.xlu1 %v42_v16  ;;  %v64_v33 = vpop.permute.xlu0 %63 }
  0x99   :  { %v41_v17 = vmul.f32 %v39_v15, %v39_v15 }
  0x9b   :  { %v45_v18 = vsel %vm28_vm0, %v41_v17, 0.0  ;;  %v784_v17 = vsel %vm776_vm4, 0.0, %v2182_v7 }
  0x9c   :  { %46 = vadd.xlane.f32.xlu1 %v45_v18  ;;  %v771_v18 = vand.u32 7, %v761_v12 }
  0x9e   :  { %vm779_vm6 = vcmp.le.s32.totalorder %v2348_v60, %v771_v18 }
 0x125   :  { %v44_v22 = vpop.xlane.xlu1 %43 }
 0x126   :  { %v48_v23 = vmul.f32 0.03125, %v44_v22  ;;  %v770_v22 = vand.u32 7, %v760_v13 }
 0x128   :  { %v50_v24 = vadd.f32 1e-05, %v48_v23  ;;  %vm778_vm7 = vcmp.le.s32.totalorder %v2348_v60, %v770_v22 }
 0x129   :  { %v47_v25 = vpop.xlane.xlu1 %46 }
 0x12a   :  { %2105 = vrsqrt.f32 %v50_v24  ;;  %v49_v26 = vmul.f32 0.03125, %v47_v25  ;;  %v785_v25 = vsel %vm777_vm5, 0.0, %v2182_v7 }
 0x12c   :  { %v51_v27 = vadd.f32 1e-05, %v49_v26  ;;  %v762_v26 = vadd.s32 40, %v2243_v5 }
 0x12e   :  { %2107 = vrsqrt.f32 %v51_v27 }
 0x134   :  { %v2106_v28 = vpop.eup %2105 }
 0x135   :  { %v54_v29 = vmul.f32 %v2106_v28, %v38_v11 }
 0x137   :  { %v60_v32 = vmul.f32 %v2252_v8, %v54_v29 }
 0x138   :  { %v2108_v30 = vpop.eup %2107 }
 0x139   :  { %v55_v31 = vmul.f32 %v2108_v30, %v39_v15  ;;  %v66_v35 = vadd.f32 %v64_v33, %v60_v32 }
 0x13b   :  { %v61_v34 = vmul.f32 %v2252_v8, %v55_v31  ;;  %v787_v31 = vsel %vm779_vm6, 0.0, %v2182_v7 }
 0x13d   :  { %v67_v36 = vadd.f32 %v64_v33, %v61_v34  ;;  %v786_v34 = vsel %vm778_vm7, 0.0, %v2182_v7 }
 0x13f   :  { %v68_v37 = vpack.c.bf16 %v67_v36, %v66_v35  ;;  %v772_v35 = vand.u32 7, %v762_v26  ;;  %v764_v36 = vadd.s32 56, %v2243_v5 }
 0x141   :  { %1952 = vmatmul.mubr.msk.bf16.vlgmr.msra.gmra.mrb[0].mxu0 %vm28_vm0, %v68_v37  ;;  %v763_v37 = vadd.s32 48, %v2243_v5  ;;  %vm780_vm8 = vcmp.le.s32.totalorder %v2348_v60, %v772_v35 }
 0x142   :  { %1957 = vmatprep.mubr.msk.f32.mxu0 %vm2175_vm1, %v2174_v20 }
 0x214   :  { %v126_v40 = vpop.f32.mrb[0].mxu0 }
 0x215   :  { %v2284_v41 = vadd.f32 %v126_v40, %v2281_v39  ;;  %v1953_v42 = vpop.f32.mrb[1].mxu0 }
 0x216   :  { %v129_v43 = vpop.f32.mrb[2].mxu0 }
 0x217   :  { %291 = vrot.lane.b32.xlu0 %v2284_v41, %s2176_s1  ;;  %134 = vrot.lane.b32.xlu1 %v2284_v41, %s2173_s0  ;;  %v1954_v44 = vpop.f32.mrb[3].mxu0  ;;  %v2292_v45 = vadd.f32 %v129_v43, %v2281_v39 }
 0x21b   :  { %289 = vrot.lane.b32.xlu0 %v2284_v41, %s2177_s30  ;;  %213 = vrot.lane.b32.xlu1 %v2284_v41, %s2178_s7 }
 0x21f   :  { %211 = vrot.lane.b32.xlu1 %v2284_v41, %s2179_s8  ;;  %446 = vrot.lane.b32.xlu0 %v2292_v45, %s2173_s0 }
 0x223   :  { %369 = vrot.lane.b32.xlu1 %v2284_v41, %s2180_s9  ;;  %522 = vrot.lane.b32.xlu0 %v2292_v45, %s2179_s8 }
 0x227   :  { %367 = vrot.lane.b32.xlu1 %v2284_v41, %s2181_s10  ;;  %680 = vrot.lane.b32.xlu0 %v2292_v45, %s2180_s9 }
 0x22b   :  { %524 = vrot.lane.b32.xlu1 %v2292_v45, %s2178_s7  ;;  %678 = vrot.lane.b32.xlu0 %v2292_v45, %s2181_s10 }
 0x22f   :  { %602 = vrot.lane.b32.xlu1 %v2292_v45, %s2176_s1 }
 0x233   :  { %600 = vrot.lane.b32.xlu1 %v2292_v45, %s2177_s30 }
 0x289   :  { %v292_v46 = vpop.permute.xlu0 %291  ;;  %v135_v47 = vpop.permute.xlu1 %134 }
 0x28a   :  { %1956 = vmatpush3.xpose.msk.msra.mxu0 %vm136_vm2, %v135_v47 }
 0x28b   :  { %1970 = vmatprep.subr.mxu0 %v2174_v20 }
 0x28d   :  { %v290_v48 = vpop.permute.xlu0 %289  ;;  %1958 = vmatmul.mubr.msk.f32.vlgmr.msra.gmra.mrb[4].mxu0 %vm136_vm2, %v2284_v41  ;;  %v214_v49 = vpop.permute.xlu1 %213 }
 0x28e   :  { %1961 = vmatpush3.xpose.msk.msra.mxu1 %vm136_vm2, %v214_v49  ;;  %1972 = vmatprep.mubr.msk.f32.mxu0 %vm2175_vm1, %v2174_v20 }
 0x28f   :  { %1965 = vmatprep.subr.mxu1 %v2174_v20 }
 0x291   :  { %v212_v50 = vpop.permute.xlu1 %211  ;;  %v447_v51 = vpop.permute.xlu0 %446 }
 0x292   :  { %1963 = vmatmul.mubr.msk.f32.vlgmr.msra.gmra.mrb[0].mxu1 %vm136_vm2, %v212_v50 }
 0x293   :  { %1966 = vmatpush3.xpose.msk.msra.mxu1 %vm136_vm2, %v292_v46  ;;  %1967 = vmatprep.mubr.msk.f32.mxu1 %vm2175_vm1, %v2174_v20 }
 0x294   :  { %1975 = vmatprep.subr.mxu1 %v2174_v20 }
 0x295   :  { %v370_v52 = vpop.permute.xlu1 %369  ;;  %v523_v53 = vpop.permute.xlu0 %522 }
 0x296   :  { %1968 = vmatmul.mubr.msk.f32.vlgmr.msra.gmra.mrb[2].mxu1 %vm136_vm2, %v290_v48  ;;  %1971 = vmatpush3.xpose.msk.msra.mxu0 %vm136_vm2, %v370_v52  ;;  %v774_v48 = vand.u32 7, %v764_v36 }
 0x297   :  { %1976 = vmatpush3.xpose.msk.msra.mxu1 %vm136_vm2, %v447_v51  ;;  %1977 = vmatprep.mubr.msk.f32.mxu1 %vm2175_vm1, %v2174_v20  ;;  %v773_v51 = vand.u32 7, %v763_v37 }
 0x298   :  { %1980 = vmatprep.subr.mxu0 %v2174_v20  ;;  %1985 = vmatprep.subr.mxu1 %v2174_v20  ;;  %vm782_vm9 = vcmp.le.s32.totalorder %v2348_v60, %v774_v48 }
 0x299   :  { %v368_v54 = vpop.permute.xlu1 %367  ;;  %v681_v56 = vpop.permute.xlu0 %680  ;;  %vm781_vm10 = vcmp.le.s32.totalorder %v2348_v60, %v773_v51 }
 0x29a   :  { %1973 = vmatmul.mubr.msk.f32.vlgmr.msra.gmra.mrb[6].mxu0 %vm136_vm2, %v368_v54  ;;  %1978 = vmatmul.mubr.msk.f32.vlgmr.msra.gmra.mrb[4].mxu1 %vm136_vm2, %v2292_v45  ;;  %v789_v2 = vsel %vm781_vm10, 0.0, %v2182_v7 }
 0x29b   :  { %1982 = vmatprep.mubr.msk.f32.mxu0 %vm2175_vm1, %v2174_v20  ;;  %1987 = vmatprep.mubr.msk.f32.mxu1 %vm2175_vm1, %v2174_v20 }
 0x29d   :  { %v525_v55 = vpop.permute.xlu1 %524  ;;  %v679_v58 = vpop.permute.xlu0 %678 }
 0x29e   :  { %1981 = vmatpush3.xpose.msk.msra.mxu0 %vm136_vm2, %v525_v55 }
 0x29f   :  { %1990 = vmatprep.subr.mxu0 %v2174_v20 }
 0x2a1   :  { %v603_v57 = vpop.permute.xlu1 %602  ;;  %1983 = vmatmul.mubr.msk.f32.vlgmr.msra.gmra.mrb[8].mxu0 %vm136_vm2, %v523_v53  ;;  %v788_v53 = vsel %vm780_vm8, 0.0, %v2182_v7 }
 0x2a2   :  { %1986 = vmatpush3.xpose.msk.msra.mxu1 %vm136_vm2, %v603_v57  ;;  %1991 = vmatpush3.xpose.msk.msra.mxu0 %vm136_vm2, %v681_v56 }
 0x2a3   :  { %1992 = vmatprep.mubr.msk.f32.mxu0 %vm2175_vm1, %v2174_v20  ;;  %2000 = vmatprep.subr.mxu0 %v2174_v20 }
 0x2a4   :  { %1995 = vmatprep.subr.mxu1 %v2174_v20 }
 0x2a5   :  { %v601_v59 = vpop.permute.xlu1 %600  ;;  %1993 = vmatmul.mubr.msk.f32.vlgmr.msra.gmra.mrb[10].mxu0 %vm136_vm2, %v679_v58  ;;  %v790_v58 = vsel %vm782_vm9, 0.0, %v2182_v7 }
 0x2a6   :  { %1988 = vmatmul.mubr.msk.f32.vlgmr.msra.gmra.mrb[6].mxu1 %vm136_vm2, %v601_v59  ;;  %2002 = vmatprep.mubr.msk.f32.mxu0 %vm2175_vm1, %v2174_v20 }
 0x2a7   :  { %1997 = vmatprep.mubr.msk.f32.mxu1 %vm2175_vm1, %v2174_v20 }
 0x360   :  { %v207_v3 = vpop.f32.mrb[4].mxu0 }
 0x361   :  { %v791_v10 = vmul.f32 0.35355338, %v207_v3  ;;  %v1959_v11 = vpop.f32.mrb[5].mxu0 }
 0x363   :  { %v2358_v14 = vadd.f32 %v791_v10, %v783_v9 }
 0x365   :  { %v285_v15 = vpop.f32.mrb[0].mxu1  ;;  %v807_v16 = vsel %vm136_vm2, %v2358_v14, -inf }
 0x366   :  { %v792_v19 = vmul.f32 0.35355338, %v285_v15  ;;  %v1964_v21 = vpop.f32.mrb[1].mxu1  ;;  %808 = vmax.xlane.f32.xlu1 %v807_v16 }
 0x368   :  { %v2364_v23 = vadd.f32 %v792_v19, %v784_v17 }
 0x369   :  { %v363_v24 = vpop.f32.mrb[2].mxu1 }
 0x36a   :  { %v793_v27 = vmul.f32 0.35355338, %v363_v24  ;;  %v1969_v28 = vpop.f32.mrb[3].mxu1  ;;  %v810_v29 = vsel %vm136_vm2, %v2364_v23, -inf }
 0x36b   :  { %811 = vmax.xlane.f32.xlu0 %v810_v29 }
 0x36c   :  { %v2372_v30 = vadd.f32 %v793_v27, %v785_v25 }
 0x36d   :  { %v441_v32 = vpop.f32.mrb[6].mxu0  ;;  %v518_v33 = vpop.f32.mrb[4].mxu1 }
 0x36e   :  { %v794_v38 = vmul.f32 0.35355338, %v441_v32  ;;  %v795_v40 = vmul.f32 0.35355338, %v518_v33  ;;  %v1974_v42 = vpop.f32.mrb[7].mxu0  ;;  %v1979_v43 = vpop.f32.mrb[5].mxu1 }
 0x36f   :  { %v813_v44 = vsel %vm136_vm2, %v2372_v30, -inf }
 0x370   :  { %814 = vmax.xlane.f32.xlu0 %v813_v44  ;;  %v803_v46 = vadd.f32 %v795_v40, %v787_v31  ;;  %v802_v47 = vadd.f32 %v794_v38, %v786_v34 }
 0x372   :  { %v819_v49 = vsel %vm136_vm2, %v803_v46, -inf  ;;  %v816_v50 = vsel %vm136_vm2, %v802_v47, -inf }
 0x373   :  { %820 = vmax.xlane.f32.xlu1 %v819_v49 }
 0x374   :  { %817 = vmax.xlane.f32.xlu0 %v816_v50  ;;  %v596_v52 = vpop.f32.mrb[8].mxu0 }
 0x375   :  { %v796_v54 = vmul.f32 0.35355338, %v596_v52  ;;  %v1984_v55 = vpop.f32.mrb[9].mxu0 }
 0x377   :  { %v804_v56 = vadd.f32 %v796_v54, %v788_v53 }
 0x378   :  { %v752_v57 = vpop.f32.mrb[10].mxu0 }
 0x379   :  { %v798_v59 = vmul.f32 0.35355338, %v752_v57  ;;  %v674_v61 = vpop.f32.mrb[6].mxu1  ;;  %v1994_v62 = vpop.f32.mrb[11].mxu0  ;;  %v822_v63 = vsel %vm136_vm2, %v804_v56, -inf }
 0x37a   :  { %v797_v3 = vmul.f32 0.35355338, %v674_v61  ;;  %v1989_v9 = vpop.f32.mrb[7].mxu1  ;;  %823 = vmax.xlane.f32.xlu0 %v822_v63 }
 0x37b   :  { %v806_v10 = vadd.f32 %v798_v59, %v790_v58 }
 0x37c   :  { %v805_v11 = vadd.f32 %v797_v3, %v789_v2 }
 0x37d   :  { %v828_v12 = vsel %vm136_vm2, %v806_v10, -inf }
 0x37e   :  { %829 = vmax.xlane.f32.xlu0 %v828_v12  ;;  %v825_v60 = vsel %vm136_vm2, %v805_v11, -inf }
 0x37f   :  { %826 = vmax.xlane.f32.xlu1 %v825_v60 }
 0x390   :  { %895 = vrot.lane.b32.xlu1 %v2284_v41, %s2183_s11 }
 0x394   :  { %1054 = vrot.lane.b32.xlu1 %v2284_v41, %s2184_s12  ;;  %972 = vrot.lane.b32.xlu0 %v2284_v41, %s2185_s13 }
 0x398   :  { %1136 = vrot.lane.b32.xlu1 %v2284_v41, %s2186_s14  ;;  %1295 = vrot.lane.b32.xlu0 %v2292_v45, %s2185_s13 }
 0x39c   :  { %1218 = vrot.lane.b32.xlu1 %v2292_v45, %s2183_s11 }
 0x3f3   :  { %v809_v7 = vpop.xlane.xlu1 %808 }
 0x3f4   :  { %v831_v4 = vsub.f32 %v2358_v14, %v809_v7 }
 0x3f6   :  { %v839_v13 = vmul.f32 1.442695, %v831_v4 }
 0x3f8   :  { %2109 = vpow2.f32 %v839_v13  ;;  %v812_v15 = vpop.xlane.xlu0 %811 }
 0x3f9   :  { %v832_v16 = vsub.f32 %v2364_v23, %v812_v15 }
 0x3fb   :  { %v841_v17 = vmul.f32 1.442695, %v832_v16 }
 0x3fd   :  { %2111 = vpow2.f32 %v841_v17  ;;  %v815_v18 = vpop.xlane.xlu0 %814 }
 0x3fe   :  { %v833_v19 = vsub.f32 %v2372_v30, %v815_v18 }
 0x400   :  { %v843_v21 = vmul.f32 1.442695, %v833_v19  ;;  %v821_v41 = vpop.xlane.xlu1 %820 }
 0x401   :  { %v835_v22 = vsub.f32 %v803_v46, %v821_v41  ;;  %v818_v24 = vpop.xlane.xlu0 %817 }
 0x402   :  { %v2110_v25 = vpop.eup %2109  ;;  %2113 = vpow2.f32 %v843_v21  ;;  %v834_v26 = vsub.f32 %v802_v47, %v818_v24 }
 0x403   :  { %v847_v27 = vmul.f32 1.442695, %v835_v22  ;;  %v855_v14 = vsel %vm136_vm2, %v2110_v25, 0.0 }
 0x404   :  { %v845_v28 = vmul.f32 1.442695, %v834_v26  ;;  %856 = vadd.xlane.f32.xlu1 %v855_v14 }
 0x405   :  { %2115 = vpow2.f32 %v847_v27 }
 0x406   :  { %2117 = vpow2.f32 %v845_v28 }
 0x407   :  { %v2112_v23 = vpop.eup %2111  ;;  %v824_v29 = vpop.xlane.xlu0 %823 }
 0x408   :  { %v836_v31 = vsub.f32 %v804_v56, %v824_v29  ;;  %v858_v32 = vsel %vm136_vm2, %v2112_v23, 0.0 }
 0x409   :  { %859 = vadd.xlane.f32.xlu0 %v858_v32 }
 0x40a   :  { %v849_v30 = vmul.f32 1.442695, %v836_v31 }
 0x40b   :  { %v830_v33 = vpop.xlane.xlu0 %829 }
 0x40c   :  { %v2406_v34 = vpop.eup %2113  ;;  %2119 = vpow2.f32 %v849_v30  ;;  %v838_v35 = vsub.f32 %v806_v10, %v830_v33  ;;  %v827_v36 = vpop.xlane.xlu1 %826 }
 0x40d   :  { %v837_v37 = vsub.f32 %v805_v11, %v827_v36  ;;  %v861_v38 = vsel %vm136_vm2, %v2406_v34, 0.0  ;;  %v2093_v36 = vld [vmem:[%s2565_s2] sm:$0xff]  }
 0x40e   :  { %v853_v40 = vmul.f32 1.442695, %v838_v35  ;;  %862 = vadd.xlane.f32.xlu1 %v861_v38 }
 0x40f   :  { %v2410_v42 = vpop.eup %2115  ;;  %v851_v43 = vmul.f32 1.442695, %v837_v37  ;;  %v973_v44 = vpop.permute.xlu0 %972  ;;  %v2094_v37 = vld [vmem:[%s2565_s2 + $0x8] sm:$0xff]  }
 0x410   :  { %v2412_v46 = vpop.eup %2117  ;;  %2121 = vpow2.f32 %v853_v40  ;;  %v896_v47 = vpop.permute.xlu1 %895  ;;  %2001 = vmatpush3.msra.mxu0 %v973_v44  ;;  %v867_v48 = vsel %vm136_vm2, %v2410_v42, 0.0 }
 0x411   :  { %2123 = vpow2.f32 %v851_v43  ;;  %1996 = vmatpush3.msra.mxu1 %v896_v47  ;;  %v864_v49 = vsel %vm136_vm2, %v2412_v46, 0.0  ;;  %2010 = vmatprep.subr.mxu0 %v2174_v20 }
 0x412   :  { %868 = vadd.xlane.f32.xlu1 %v867_v48  ;;  %865 = vadd.xlane.f32.xlu0 %v864_v49 }
 0x413   :  { %2005 = vmatprep.subr.mxu1 %v2174_v20  ;;  %v1296_v61 = vpop.permute.xlu0 %1295 }
 0x414   :  { %v1055_v56 = vpop.permute.xlu1 %1054 }
 0x416   :  { %v2120_v50 = vpop.eup %2119 }
 0x417   :  { %v870_v51 = vsel %vm136_vm2, %v2120_v50, 0.0 }
 0x418   :  { %871 = vadd.xlane.f32.xlu0 %v870_v51  ;;  %v1137_v57 = vpop.permute.xlu1 %1136 }
 0x41a   :  { %v2421_v52 = vpop.eup %2121 }
 0x41b   :  { %v2423_v53 = vpop.eup %2123  ;;  %v876_v54 = vsel %vm136_vm2, %v2421_v52, 0.0 }
 0x41c   :  { %877 = vadd.xlane.f32.xlu0 %v876_v54  ;;  %v873_v55 = vsel %vm136_vm2, %v2423_v53, 0.0  ;;  %v1219_v58 = vpop.permute.xlu1 %1218 }
 0x41d   :  { %874 = vadd.xlane.f32.xlu1 %v873_v55 }
 0x42e   :  { %1376 = vrot.lane.b32.xlu1 %v2292_v45, %s2184_s12 }
 0x432   :  { %1457 = vrot.lane.b32.xlu0 %v2292_v45, %s2186_s14 }
 0x491   :  { %v857_v59 = vpop.xlane.xlu1 %856 }
 0x492   :  { %2125 = vrcp.f32 %v857_v59 }
 0x496   :  { %v860_v62 = vpop.xlane.xlu0 %859 }
 0x497   :  { %2127 = vrcp.f32 %v860_v62 }
 0x49b   :  { %v863_v63 = vpop.xlane.xlu1 %862 }
 0x49c   :  { %v2126_v2 = vpop.eup %2125  ;;  %2129 = vrcp.f32 %v863_v63 }
 0x49d   :  { %v887_v3 = vmul.f32 %v2126_v2, %v2110_v25 }
 0x49f   :  { %v869_v9 = vpop.xlane.xlu1 %868  ;;  %v866_v10 = vpop.xlane.xlu0 %865  ;;  %1998 = vmatmul.mubr.msk.f32.vlgmr.msra.gmra.mrb[8].mxu1 %vm136_vm2, %v887_v3 }
 0x4a0   :  { %2131 = vrcp.f32 %v869_v9  ;;  %2006 = vmatpush3.msra.mxu1 %v1055_v56  ;;  %2007 = vmatprep.mubr.msk.f32.mxu1 %vm2175_vm1, %v2174_v20 }
 0x4a1   :  { %v2128_v45 = vpop.eup %2127  ;;  %2133 = vrcp.f32 %v866_v10  ;;  %2015 = vmatprep.subr.mxu1 %v2174_v20 }
 0x4a2   :  { %v888_v11 = vmul.f32 %v2128_v45, %v2112_v23 }
 0x4a4   :  { %2003 = vmatmul.mubr.msk.f32.vlgmr.msra.gmra.mrb[12].mxu0 %vm136_vm2, %v888_v11 }
 0x4a5   :  { %2011 = vmatpush3.msra.mxu0 %v1137_v57  ;;  %v872_v12 = vpop.xlane.xlu0 %871  ;;  %2012 = vmatprep.mubr.msk.f32.mxu0 %vm2175_vm1, %v2174_v20 }
 0x4a6   :  { %v2130_v60 = vpop.eup %2129  ;;  %2135 = vrcp.f32 %v872_v12  ;;  %2020 = vmatprep.subr.mxu0 %v2174_v20 }
 0x4a7   :  { %v889_v7 = vmul.f32 %v2130_v60, %v2406_v34 }
 0x4a9   :  { %2008 = vmatmul.mubr.msk.f32.vlgmr.msra.gmra.mrb[10].mxu1 %vm136_vm2, %v889_v7  ;;  %v878_v4 = vpop.xlane.xlu0 %877 }
 0x4aa   :  { %v2132_v13 = vpop.eup %2131  ;;  %2016 = vmatpush3.msra.mxu1 %v1219_v58  ;;  %2137 = vrcp.f32 %v878_v4  ;;  %v875_v15 = vpop.xlane.xlu1 %874  ;;  %2017 = vmatprep.mubr.msk.f32.mxu1 %vm2175_vm1, %v2174_v20 }
 0x4ab   :  { %v2134_v16 = vpop.eup %2133  ;;  %v891_v17 = vmul.f32 %v2132_v13, %v2410_v42  ;;  %2139 = vrcp.f32 %v875_v15  ;;  %2025 = vmatprep.subr.mxu1 %v2174_v20  ;;  %v2095_v15 = vld [vmem:[%s2566_s3] sm:$0xff]  }
 0x4ac   :  { %v890_v18 = vmul.f32 %v2134_v16, %v2412_v46  ;;  %v2096_v16 = vld [vmem:[%s2566_s3 + $0x8] sm:$0xff]  }
 0x4ad   :  { %2018 = vmatmul.mubr.msk.f32.vlgmr.msra.gmra.mrb[12].mxu1 %vm136_vm2, %v891_v17  ;;  %v1458_v22 = vpop.permute.xlu0 %1457 }
 0x4ae   :  { %2013 = vmatmul.mubr.msk.f32.vlgmr.msra.gmra.mrb[14].mxu0 %vm136_vm2, %v890_v18  ;;  %v1377_v19 = vpop.permute.xlu1 %1376  ;;  %2027 = vmatprep.mubr.msk.f32.mxu1 %vm2175_vm1, %v2174_v20 }
 0x4af   :  { %2021 = vmatpush3.msra.mxu0 %v1296_v61  ;;  %2026 = vmatpush3.msra.mxu1 %v1377_v19 }
 0x4b0   :  { %v2136_v21 = vpop.eup %2135  ;;  %2022 = vmatprep.mubr.msk.f32.mxu0 %vm2175_vm1, %v2174_v20  ;;  %2030 = vmatprep.subr.mxu0 %v2174_v20 }
 0x4b1   :  { %v892_v41 = vmul.f32 %v2136_v21, %v2120_v50  ;;  %2051 = vmatprep.subr.bf16.mxu1 %v2174_v20 }
 0x4b3   :  { %2023 = vmatmul.mubr.msk.f32.vlgmr.msra.gmra.mrb[16].mxu0 %vm136_vm2, %v892_v41 }
 0x4b4   :  { %v2138_v24 = vpop.eup %2137  ;;  %2031 = vmatpush3.msra.mxu0 %v1458_v22  ;;  %2032 = vmatprep.mubr.msk.f32.mxu0 %vm2175_vm1, %v2174_v20 }
 0x4b5   :  { %v2140_v25 = vpop.eup %2139  ;;  %v894_v26 = vmul.f32 %v2138_v24, %v2421_v52  ;;  %2035 = vmatprep.subr.bf16.mxu0 %v2174_v20 }
 0x4b6   :  { %v893_v27 = vmul.f32 %v2140_v25, %v2423_v53 }
 0x4b7   :  { %2033 = vmatmul.mubr.msk.f32.vlgmr.msra.gmra.mrb[18].mxu0 %vm136_vm2, %v894_v26 }
 0x4b8   :  { %2028 = vmatmul.mubr.msk.f32.vlgmr.msra.gmra.mrb[14].mxu1 %vm136_vm2, %v893_v27  ;;  %2039 = vmatprep.mubr.msk.bf16.mxu0 %vm2175_vm1, %v2174_v20 }
 0x4b9   :  { %2067 = vmatprep.mubr.msk.bf16.mxu1 %vm2175_vm1, %v2174_v20  ;;  %2036 = vmatpush3.bf16.msra.mxu0 %v2093_v36  ;;  %v2101_v36 = vld [vmem:[%s2567_s4 + $0x20] sm:$0xff]  }
 0x4ba   :  { %2037 = vmatprep.subr.bf16.mxu0 %v2174_v20 }
 0x4bd   :  { %2038 = vmatpush3.bf16.msra.mxu0 %v2094_v37  ;;  %v2102_v37 = vld [vmem:[%s2567_s4 + $0x28] sm:$0xff]  }
 0x4be   :  { %2043 = vmatprep.subr.bf16.mxu0 %v2174_v20 }
 0x572   :  { %v967_v14 = vpop.f32.mrb[8].mxu1 }
 0x573   :  { %971 = vst.msk [vmem:[#allocation2] sm:$0xff] %vm136_vm2, %v967_v14  ;;  %v1999_v28 = vpop.f32.mrb[9].mxu1 }
 0x577   :  { %v1044_v23 = vpop.f32.mrb[12].mxu0 }
 0x578   :  { %1049 = vrot.lane.b32.xlu1 %v1044_v23, %s2187_s15  ;;  %v2004_v29 = vpop.f32.mrb[13].mxu0 }
 0x57c   :  { %v1126_v31 = vpop.f32.mrb[10].mxu1 }
 0x57d   :  { %v2009_v32 = vpop.f32.mrb[11].mxu1  ;;  %1131 = vrot.lane.b32.xlu1 %v1126_v31, %s2188_s16 }
 0x580   :  { %v1290_v30 = vpop.f32.mrb[12].mxu1 }
 0x581   :  { %v1208_v33 = vpop.f32.mrb[14].mxu0  ;;  %1294 = vst.msk [vmem:[#allocation2 + $0x8] sm:$0xff] %vm136_vm2, %v1290_v30  ;;  %v2019_v34 = vpop.f32.mrb[13].mxu1  ;;  %v2097_v30 = vld [vmem:[%s2567_s4] sm:$0xff]  }
 0x582   :  { %1213 = vrot.lane.b32.xlu1 %v1208_v33, %s2189_s17  ;;  %v2014_v35 = vpop.f32.mrb[15].mxu0  ;;  %2052 = vmatpush3.bf16.msra.mxu1 %v2097_v30  ;;  %v2098_v33 = vld [vmem:[%s2567_s4 + $0x8] sm:$0xff]   ;;  %v2099_v34 = vld [vmem:[%s2567_s4 + $0x10] sm:$0xff]  }
 0x583   :  { %2053 = vmatprep.subr.bf16.mxu1 %v2174_v20  ;;  %v2100_v35 = vld [vmem:[%s2567_s4 + $0x18] sm:$0xff]  }
 0x586   :  { %v1367_v38 = vpop.f32.mrb[16].mxu0  ;;  %1558 = vrot.lane.b32.xlu1 %v2281_v39, %s2190_s22  ;;  %2054 = vmatpush3.bf16.msra.mxu1 %v2098_v33 }
 0x587   :  { %1372 = vrot.lane.b32.xlu0 %v1367_v38, %s2187_s15  ;;  %v2024_v40 = vpop.f32.mrb[17].mxu0  ;;  %2055 = vmatprep.subr.bf16.mxu1 %v2174_v20  ;;  %v2103_v38 = vld [vmem:[%s2567_s4 + $0x30] sm:$0xff]  }
 0x588   :  { %v2104_v40 = vld [vmem:[%s2567_s4 + $0x38] sm:$0xff]   ;;  %s2191_s4 = smov [#allocation3]  }
 0x589   :  { %s1845_s14 = sshll.u32 %s2191_s4, 4  ;;  %s1846_s14 = int_to_ptr.vmem [resolvable:$true] %s1845_s14 }
 0x58a   :  { %v1529_v42 = vpop.f32.mrb[18].mxu0  ;;  %2056 = vmatpush3.bf16.msra.mxu1 %v2099_v34  ;;  %p2154_p1 = scmp.lt.s32.totalorder %s1846_s14, %s1846_s14 }
 0x58b   :  { %v1448_v43 = vpop.f32.mrb[14].mxu1  ;;  %v2034_v44 = vpop.f32.mrb[19].mxu0  ;;  %2057 = vmatprep.subr.bf16.mxu1 %v2174_v20 }
 0x58c   :  { %v2029_v46 = vpop.f32.mrb[15].mxu1  ;;  %1453 = vrot.lane.b32.xlu0 %v1448_v43, %s2188_s16  ;;  %s2149_s16 = scalar_lea.vmem %s1846_s14, 256 }
 0x58d   :  { %p2150_p0 = scmp.ne.s32.totalorder %s1846_s14, %s2149_s16  ;;  %p2155_p2 = scmp.lt.s32.totalorder %s2149_s16, %s2149_s16 }
 0x58e   :  { %2058 = vmatpush3.bf16.msra.mxu1 %v2100_v35 }
 0x58f   :  { %2059 = vmatprep.subr.bf16.mxu1 %v2174_v20  ;;  %p2156_p3 = por %p2155_p2, %p2154_p1 }
 0x590   :  { %1534 = vrot.lane.b32.xlu0 %v1529_v42, %s2189_s17  ;;  %v1650_v42 = vsub.s32 2, %v2243_v5 }
 0x591   :  { %p2157_p4 = pnand %p2156_p3, %p2150_p0 }
 0x592   :  { %2060 = vmatpush3.bf16.msra.mxu1 %v2101_v36  ;;  %v1651_v43 = vrot.slane %v2248_v6, %v1650_v42 }
 0x593   :  { %2061 = vmatprep.subr.bf16.mxu1 %v2174_v20 }
 0x596   :  { %2062 = vmatpush3.bf16.msra.mxu1 %v2102_v37 }
 0x597   :  { %2063 = vmatprep.subr.bf16.mxu1 %v2174_v20 }
 0x59a   :  { %2064 = vmatpush3.bf16.msra.mxu1 %v2103_v38 }
 0x59b   :  { %2065 = vmatprep.subr.bf16.mxu1 %v2174_v20 }
 0x59e   :  { %2066 = vmatpush3.bf16.msra.mxu1 %v2104_v40 }
 0x5ea   :  { %v1050_v47 = vpop.permute.xlu1 %1049 }
 0x5eb   :  { %1053 = vst.msk [vmem:[#allocation2] sm:$0xff] %vm1052_vm11, %v1050_v47 }
 0x5ef   :  { %v1132_v48 = vpop.permute.xlu1 %1131 }
 0x5f0   :  { %1135 = vst.msk [vmem:[#allocation2] sm:$0xff] %vm1134_vm12, %v1132_v48 }
 0x5f4   :  { %v1214_v49 = vpop.permute.xlu1 %1213 }
 0x5f5   :  { %1217 = vst.msk [vmem:[#allocation2] sm:$0xff] %vm1216_vm13, %v1214_v49 }
 0x5f8   :  { %v1559_v39 = vpop.permute.xlu1 %1558 }
 0x5f9   :  { %v1373_v50 = vpop.permute.xlu0 %1372 }
 0x5fa   :  { %1375 = vst.msk [vmem:[#allocation2 + $0x8] sm:$0xff] %vm1052_vm11, %v1373_v50 }
 0x5fc   :  { %v1538_v53 = vld [vmem:[#allocation2] sm:$0xff] }
 0x5fe   :  { %v1454_v51 = vpop.permute.xlu0 %1453 }
 0x5ff   :  { %1456 = vst.msk [vmem:[#allocation2 + $0x8] sm:$0xff] %vm1134_vm12, %v1454_v51 }
 0x602   :  { %v1535_v52 = vpop.permute.xlu0 %1534 }
 0x603   :  { %1537 = vst.msk [vmem:[#allocation2 + $0x8] sm:$0xff] %vm1216_vm13, %v1535_v52 }
 0x60a   :  { %v1539_v54 = vld [vmem:[#allocation2 + $0x8] sm:$0xff] }
 0x60b   :  { %v1540_v55 = vpack.c.bf16 %v1539_v54, %v1538_v53 }
 0x60d   :  { %2040 = vmatmul.mubr.msk.bf16.vlgmr.msra.gmra.mrb[20].mxu0 %vm28_vm0, %v1540_v55 }
 0x60e   :  { %2047 = vmatprep.mubr.msk.bf16.mxu0 %vm2175_vm1, %v2174_v20  ;;  %2044 = vmatpush3.bf16.msra.mxu0 %v2095_v15 }
 0x60f   :  { %2045 = vmatprep.subr.bf16.mxu0 %v2174_v20 }
 0x612   :  { %2046 = vmatpush3.bf16.msra.mxu0 %v2096_v16 }
 0x6e0   :  { %v1598_v56 = vpop.f32.mrb[20].mxu0 }
 0x6e1   :  { %v1599_v57 = vadd.f32 %v1598_v56, %v1559_v39  ;;  %v2041_v58 = vpop.f32.mrb[21].mxu0 }
 0x6e2   :  { %v1601_v59 = vpop.f32.mrb[22].mxu0 }
 0x6e3   :  { %v2486_v61 = vadd.f32 %v1599_v57, %v2231_v0  ;;  %v1602_v62 = vadd.f32 %v1601_v59, %v1559_v39  ;;  %v2042_v63 = vpop.f32.mrb[23].mxu0 }
 0x6e5   :  { %v2489_v2 = vadd.f32 %v1602_v62, %v2236_v1  ;;  %v1607_v3 = vsel %vm28_vm0, %v2486_v61, 0.0 }
 0x6e6   :  { %1608 = vadd.xlane.f32.xlu0 %v1607_v3 }
 0x6e7   :  { %v1610_v9 = vsel %vm28_vm0, %v2489_v2, 0.0 }
 0x6e8   :  { %1611 = vadd.xlane.f32.xlu1 %v1610_v9 }
 0x6f9   :  { %1638 = vrot.lane.b32.xlu1 %v2252_v8, %s2190_s22 }
 0x773   :  { %v1609_v10 = vpop.xlane.xlu0 %1608 }
 0x774   :  { %v1613_v45 = vmul.f32 0.03125, %v1609_v10 }
 0x775   :  { %v1612_v0 = vpop.xlane.xlu1 %1611 }
 0x776   :  { %v1615_v11 = vsub.f32 %v2486_v61, %v1613_v45  ;;  %v1614_v12 = vmul.f32 0.03125, %v1612_v0 }
 0x778   :  { %v1616_v1 = vsub.f32 %v2489_v2, %v1614_v12  ;;  %v1617_v60 = vmul.f32 %v1615_v11, %v1615_v11  ;;  %v1745_v12 = vsub.s32 3, %v2243_v5 }
 0x779   :  { %v1639_v28 = vpop.permute.xlu1 %1638 }
 0x77a   :  { %v1619_v7 = vsel %vm28_vm0, %v1617_v60, 0.0  ;;  %v1618_v4 = vmul.f32 %v1616_v1, %v1616_v1 }
 0x77b   :  { %1620 = vadd.xlane.f32.xlu0 %v1619_v7 }
 0x77c   :  { %v1622_v13 = vsel %vm28_vm0, %v1618_v4, 0.0 }
 0x77f   :  { %1623 = vadd.xlane.f32.xlu0 %v1622_v13 }
 0x795   :  { %1633 = vrot.lane.b32.xlu0 %v2252_v8, %s2183_s11 }
 0x808   :  { %v1621_v17 = vpop.xlane.xlu0 %1620 }
 0x809   :  { %v1625_v18 = vmul.f32 0.03125, %v1621_v17 }
 0x80b   :  { %v1627_v19 = vadd.f32 1e-05, %v1625_v18 }
 0x80c   :  { %v1624_v21 = vpop.xlane.xlu0 %1623 }
 0x80d   :  { %2141 = vrsqrt.f32 %v1627_v19  ;;  %v1626_v41 = vmul.f32 0.03125, %v1624_v21 }
 0x80f   :  { %v1628_v22 = vadd.f32 1e-05, %v1626_v41 }
 0x810   :  { %v1634_v25 = vpop.permute.xlu0 %1633 }
 0x811   :  { %2143 = vrsqrt.f32 %v1628_v22 }
 0x817   :  { %v2142_v8 = vpop.eup %2141 }
 0x818   :  { %v1631_v24 = vmul.f32 %v2142_v8, %v1615_v11 }
 0x81a   :  { %v1636_v14 = vmul.f32 %v1634_v25, %v1631_v24 }
 0x81b   :  { %v2144_v26 = vpop.eup %2143 }
 0x81c   :  { %v1632_v27 = vmul.f32 %v2144_v26, %v1616_v1  ;;  %v1641_v29 = vadd.f32 %v1639_v28, %v1636_v14  ;;  %v1746_v1 = vrot.slane %v2248_v6, %v1745_v12 }
 0x81e   :  { %v1637_v23 = vmul.f32 %v1634_v25, %v1632_v27 }
 0x820   :  { %v1642_v31 = vadd.f32 %v1639_v28, %v1637_v23 }
 0x822   :  { %v1643_v32 = vpack.c.bf16 %v1642_v31, %v1641_v29 }
 0x824   :  { %2048 = vmatmul.mubr.msk.bf16.vlgmr.msra.gmra.mrb[24].mxu0 %vm28_vm0, %v1643_v32 }
 0x8f7   :  { %v1701_v44 = vpop.f32.mrb[24].mxu0 }
 0x8f8   :  { %v1702_v46 = vadd.f32 %v1701_v44, %v1651_v43  ;;  %v2049_v47 = vpop.f32.mrb[25].mxu0 }
 0x8f9   :  { %v1704_v48 = vpop.f32.mrb[26].mxu0 }
 0x8fa   :  { %v1710_v49 = vmul.f32 0.044715, %v1702_v46  ;;  %v1705_v50 = vadd.f32 %v1704_v48, %v1651_v43  ;;  %v2050_v51 = vpop.f32.mrb[27].mxu0  ;;  %v1708_v3 = vmul.f32 0.5, %v1702_v46 }
 0x8fc   :  { %v1712_v52 = vmul.f32 %v1710_v49, %v1702_v46  ;;  %v1711_v53 = vmul.f32 0.044715, %v1705_v50  ;;  %v1709_v9 = vmul.f32 0.5, %v1705_v50 }
 0x8fe   :  { %v1714_v54 = vmul.f32 %v1712_v52, %v1702_v46  ;;  %v1713_v55 = vmul.f32 %v1711_v53, %v1705_v50 }
 0x900   :  { %v1716_v39 = vadd.f32 %v1714_v54, %v1702_v46  ;;  %v1715_v56 = vmul.f32 %v1713_v55, %v1705_v50 }
 0x902   :  { %v1718_v57 = vmul.f32 0.7978846, %v1716_v39  ;;  %v1717_v20 = vadd.f32 %v1715_v56, %v1705_v50 }
 0x904   :  { %2145 = vtanh.f32 %v1718_v57  ;;  %v1719_v58 = vmul.f32 0.7978846, %v1717_v20 }
 0x906   :  { %2147 = vtanh.f32 %v1719_v58 }
 0x90e   :  { %v2146_v59 = vpop.eup %2145 }
 0x90f   :  { %v1722_v62 = vadd.f32 1.0, %v2146_v59 }
 0x910   :  { %v2148_v63 = vpop.eup %2147 }
 0x911   :  { %v1723_v10 = vadd.f32 1.0, %v2148_v63  ;;  %v1724_v45 = vmul.f32 %v1722_v62, %v1708_v3 }
 0x913   :  { %v1725_v0 = vmul.f32 %v1723_v10, %v1709_v9 }
 0x915   :  { %v1726_v11 = vpack.c.bf16 %v1725_v0, %v1724_v45 }
 0x917   :  { %2068 = vmatmul.mubr.bf16.vlgmr.msra.gmra.mrb[16].mxu1 %v1726_v11 }
 0x9ea   :  { %v1829_v60 = vpop.f32.mrb[16].mxu1 }
 0x9eb   :  { %v1830_v7 = vadd.f32 %v1829_v60, %v1746_v1  ;;  %v2069_v4 = vpop.f32.mrb[17].mxu1 }
 0x9ec   :  { %v1832_v13 = vpop.f32.mrb[18].mxu1 }
 0x9ed   :  { %v1836_v15 = vadd.f32 %v1830_v7, %v2486_v61  ;;  %v1833_v16 = vadd.f32 %v1832_v13, %v1746_v1  ;;  %v2070_v17 = vpop.f32.mrb[19].mxu1 }
 0x9ef   :  { %1838 = vst.msk [vmem:[#allocation3] sm:$0xff] %vm28_vm0, %v1836_v15  ;;  %v1837_v18 = vadd.f32 %v1833_v16, %v2489_v2 }
 0x9f1   :  { %1839 = vst.msk [vmem:[#allocation3 + $0x8] sm:$0xff] %vm28_vm0, %v1837_v18 }
 0x9f2   :  { %2160 = shalt.err (!%p2157_p4)
}
 0x9f3   :  { %s2161_s19 = scalar_lea.hbm %s2569_s6, 256 }
 0x9f4   :  { %p2162_p5 = scmp.ne.s32.totalorder %s2569_s6, %s2161_s19  ;;  %p2165_p6 = scmp.lt.u32.totalorder %s2161_s19, %s2569_s6 }
 0x9f6   :  { %p2167_p7 = pnand %p2165_p6, %p2162_p5 }
 0x9f8   :  { %2170 = shalt.err (!%p2167_p7)
}
 0x9f9   :  { %s2192_s23 = smov 128  }
 0x9fa   :  { %1851 = dma.vmem_to_hbm [thread:$0]  %s1846_s14, 256, %s2569_s6, [#allocation4], %s2192_s23, %s2192_s23, %s2187_s15  }
 0x9fb   :  { %2171 = dma.done.wait [#allocation4], 256  }
 0x9fc   :  { %2172 = vsyncadd [#allocation4], 4294967040 }
 0x9fd   :  { %1855 = vsyncpa [#allocation4], 1 }

</bundles_post_ra>
